<compile_context>
chip_gen: v5e
topology: v5e:2x2
jax: 0.10.0
libtpu: 0.0.40
codegen_flags: <defaults>
</compile_context>

<pallas_src>
import functools

import jax
import jax.numpy as jnp
from jax.experimental import pallas as pl
from jax.experimental.pallas import tpu as pltpu


_VMEM_LIMIT_BYTES = 32 * 1024 * 1024    # explicit scoped-VMEM limit, safe on v5e/v6e/v7x
_TILE_BUDGET_BYTES = 24 * 1024 * 1024   # budget for double-buffered (input + output) tiles
_MAX_TILE_D = 2048                      # lane-tile cap (amortizes per-step overhead)


def _round_down_lanes(n):
    return max(128, (n // 128) * 128)


def _pick_tile_d(rows_per_block, n_neurons, itemsize):
    """Largest lane-multiple feature tile whose double-buffered in+out fits the budget."""
    if n_neurons <= 128:
        return n_neurons                       # full feature dim (satisfies the (8,128) rule)
    per_lane = 4 * rows_per_block * itemsize   # 2 buffers x (input + output) per lane column
    max_lanes = max(128, _TILE_BUDGET_BYTES // per_lane)
    tile = min(n_neurons, max_lanes, _MAX_TILE_D)
    return _round_down_lanes(tile)


# ---------------------------------------------------------------------------
# Single-pass path: whole batch resident per feature tile.
# ---------------------------------------------------------------------------
def _bn_fused_kernel(x_ref, gamma_ref, beta_ref, o_ref, *, eps):
    # Stats in f32 (no-op cast for f32 inputs); reduction over axis 0 (batch).
    x = x_ref[...].astype(jnp.float32)
    mean = jnp.mean(x, axis=0, keepdims=True)                # (1, TILE_D)
    xc = x - mean                                            # centered once, reused below
    var = jnp.mean(xc * xc, axis=0, keepdims=True)           # biased variance (unbiased=False)
    scale = gamma_ref[...].astype(jnp.float32) * jax.lax.rsqrt(var + eps)
    out = xc * scale + beta_ref[...].astype(jnp.float32)     # 2 VALU ops/elem after centering
    o_ref[...] = out.astype(o_ref.dtype)


def _batchnorm_single_pass(x, gamma2d, beta2d, eps, tile_d=None):
    n_batch, n_neurons = x.shape
    itemsize = x.dtype.itemsize
    if tile_d is None:
        tile_d = _pick_tile_d(n_batch, n_neurons, itemsize)
    grid = (pl.cdiv(n_neurons, tile_d),)

    cost = pl.CostEstimate(
        flops=5 * n_batch * n_neurons,
        transcendentals=n_neurons,
        bytes_accessed=2 * n_batch * n_neurons * itemsize + 2 * n_neurons * 4,
    )
    return pl.pallas_call(
        functools.partial(_bn_fused_kernel, eps=eps),
        out_shape=jax.ShapeDtypeStruct((n_batch, n_neurons), x.dtype),
        grid=grid,
        in_specs=[
            pl.BlockSpec((n_batch, tile_d), lambda j: (0, j)),
            pl.BlockSpec((1, tile_d), lambda j: (0, j)),
            pl.BlockSpec((1, tile_d), lambda j: (0, j)),
        ],
        out_specs=pl.BlockSpec((n_batch, tile_d), lambda j: (0, j)),
        compiler_params=pltpu.CompilerParams(
            dimension_semantics=("parallel",),
            vmem_limit_bytes=_VMEM_LIMIT_BYTES,
        ),
        cost_estimate=cost,
    )(x, gamma2d, beta2d)


# ---------------------------------------------------------------------------
# Two-pass path: batch tiled as well (for batches too large to keep resident).
# ---------------------------------------------------------------------------
def _bn_stats_kernel(x_ref, sum_ref, sumsq_ref, *, n_batch, tile_b):
    bi = pl.program_id(1)  # batch-tile index (reduction axis, last in grid)

    @pl.when(bi == 0)
    def _():
        sum_ref[...] = jnp.zeros_like(sum_ref)
        sumsq_ref[...] = jnp.zeros_like(sumsq_ref)

    x = x_ref[...].astype(jnp.float32)
    if n_batch % tile_b != 0:
        # Mask padded rows of the last (partial) batch tile before reducing.
        row = bi * tile_b + jax.lax.broadcasted_iota(jnp.int32, x.shape, 0)
        x = jnp.where(row < n_batch, x, 0.0)
    sum_ref[...] += jnp.sum(x, axis=0, keepdims=True)
    sumsq_ref[...] += jnp.sum(x * x, axis=0, keepdims=True)


def _bn_apply_kernel(x_ref, scale_ref, shift_ref, o_ref):
    x = x_ref[...].astype(jnp.float32)
    o_ref[...] = (x * scale_ref[...] + shift_ref[...]).astype(o_ref.dtype)


def _batchnorm_two_pass(x, gamma2d, beta2d, eps, tile_b=None, tile_d=None):
    n_batch, n_neurons = x.shape
    itemsize = x.dtype.itemsize

    if tile_b is None:
        tile_b = min(1024, n_batch)
    if tile_b != n_batch:
        tile_b = max(8, (tile_b // 8) * 8)   # sublane multiple unless it is the full batch
    if tile_d is None:
        tile_d = _pick_tile_d(tile_b, n_neurons, itemsize)

    d_tiles = pl.cdiv(n_neurons, tile_d)
    b_tiles = pl.cdiv(n_batch, tile_b)

    # Pass 1: per-feature sum / sum-of-squares accumulated across batch tiles.
    stats_cost = pl.CostEstimate(
        flops=3 * n_batch * n_neurons,
        transcendentals=0,
        bytes_accessed=n_batch * n_neurons * itemsize + 2 * n_neurons * 4,
    )
    sum_x, sum_xx = pl.pallas_call(
        functools.partial(_bn_stats_kernel, n_batch=n_batch, tile_b=tile_b),
        out_shape=(
            jax.ShapeDtypeStruct((1, n_neurons), jnp.float32),
            jax.ShapeDtypeStruct((1, n_neurons), jnp.float32),
        ),
        grid=(d_tiles, b_tiles),
        in_specs=[pl.BlockSpec((tile_b, tile_d), lambda j, i: (i, j))],
        out_specs=(
            pl.BlockSpec((1, tile_d), lambda j, i: (0, j)),
            pl.BlockSpec((1, tile_d), lambda j, i: (0, j)),
        ),
        compiler_params=pltpu.CompilerParams(
            dimension_semantics=("parallel", "arbitrary"),
            vmem_limit_bytes=_VMEM_LIMIT_BYTES,
        ),
        cost_estimate=stats_cost,
    )(x)

    # Tiny (1, D) math in plain XLA: fold gamma/rsqrt/mean/beta into scale/shift.
    inv_n = 1.0 / n_batch
    mean = sum_x * inv_n
    var = jnp.maximum(sum_xx * inv_n - mean * mean, 0.0)   # biased var; guard cancellation
    scale = gamma2d * jax.lax.rsqrt(var + eps)
    shift = beta2d - mean * scale

    # Pass 2: stream x again, apply out = x * scale + shift.
    apply_cost = pl.CostEstimate(
        flops=2 * n_batch * n_neurons,
        transcendentals=0,
        bytes_accessed=2 * n_batch * n_neurons * itemsize + 2 * n_neurons * 4,
    )
    return pl.pallas_call(
        _bn_apply_kernel,
        out_shape=jax.ShapeDtypeStruct((n_batch, n_neurons), x.dtype),
        grid=(d_tiles, b_tiles),
        in_specs=[
            pl.BlockSpec((tile_b, tile_d), lambda j, i: (i, j)),
            pl.BlockSpec((1, tile_d), lambda j, i: (0, j)),
            pl.BlockSpec((1, tile_d), lambda j, i: (0, j)),
        ],
        out_specs=pl.BlockSpec((tile_b, tile_d), lambda j, i: (i, j)),
        compiler_params=pltpu.CompilerParams(
            dimension_semantics=("parallel", "parallel"),
            vmem_limit_bytes=_VMEM_LIMIT_BYTES,
        ),
        cost_estimate=apply_cost,
    )(x, scale, shift)


# ---------------------------------------------------------------------------
# Public entry point (forward of CustomBatchNormAutograd).
# ---------------------------------------------------------------------------
def custom_batchnorm(x, gamma, beta, eps=1e-5, *, force_two_pass=False,
                     tile_b=None, tile_d=None):
    """x: (n_batch, n_neurons), gamma/beta: (n_neurons,)."""
    n_batch, n_neurons = x.shape
    assert gamma.shape == (n_neurons,) and beta.shape == (n_neurons,)
    gamma2d = gamma.reshape(1, n_neurons).astype(jnp.float32)
    beta2d = beta.reshape(1, n_neurons).astype(jnp.float32)
    itemsize = x.dtype.itemsize

    # Single-pass needs the whole batch for one 128-lane feature tile (double
    # buffered, input + output) to fit the VMEM tile budget.
    single_pass_fits = 4 * n_batch * 128 * itemsize <= _TILE_BUDGET_BYTES
    if single_pass_fits and not force_two_pass:
        return _batchnorm_single_pass(x, gamma2d, beta2d, eps, tile_d=tile_d)
    return _batchnorm_two_pass(x, gamma2d, beta2d, eps, tile_b=tile_b, tile_d=tile_d)


def batchnorm_ref(x, gamma, beta, eps=1e-5):
    mean = x.mean(axis=0)
    var = ((x - mean) ** 2).mean(axis=0)  # unbiased=False
    return (x - mean) / jnp.sqrt(var + eps) * gamma + beta


if __name__ == "__main__":
    n_batch, n_neurons = 20, 256
    key = jax.random.PRNGKey(0)
    x = jax.random.normal(key, (n_batch, n_neurons), dtype=jnp.float32)

    # Parameters as initialized by the module: gamma = ones, beta = zeros.
    gamma = jnp.ones((n_neurons,), dtype=jnp.float32)
    beta = jnp.zeros((n_neurons,), dtype=jnp.float32)

    ref = batchnorm_ref(x, gamma, beta, eps=1e-5)

    # Main path: feature-tiled, whole batch resident per tile (auto tile size).
    out = jax.block_until_ready(custom_batchnorm(x, gamma, beta, eps=1e-5))
    assert out.shape == (n_batch, n_neurons)
    assert jnp.allclose(out, ref, atol=1e-5, rtol=1e-5), "single-pass mismatch vs reference"

    # Same path with a forced 128-lane tile to exercise multiple feature tiles.
    out_tiled = jax.block_until_ready(
        custom_batchnorm(x, gamma, beta, eps=1e-5, tile_d=128)
    )
    assert jnp.allclose(out_tiled, ref, atol=1e-5, rtol=1e-5), "tiled single-pass mismatch"

    # Large-batch path forced at a small shape: two-pass sum/sumsq accumulation
    # over batch tiles (also exercises partial-tile masking since 20 % 8 != 0).
    out_two_pass = jax.block_until_ready(
        custom_batchnorm(x, gamma, beta, eps=1e-5, force_two_pass=True,
                         tile_b=8, tile_d=128)
    )
    assert jnp.allclose(out_two_pass, ref, atol=1e-4, rtol=1e-4), "two-pass mismatch"

    print("KERNEL_OK")
</pallas_src>

<mosaic_0001>
module attributes {stable_mosaic.version = 11 : i64} {
  func.func @_bn_fused_kernel(%arg0: i32, %arg1: memref<20x256xf32, #tpu.memory_space<vmem>>, %arg2: memref<1x256xf32, #tpu.memory_space<vmem>>, %arg3: memref<1x256xf32, #tpu.memory_space<vmem>>, %arg4: memref<20x256xf32, #tpu.memory_space<vmem>>) attributes {dimension_semantics = [#tpu.dimension_semantics<parallel>], iteration_bounds = array<i64: 1>, scalar_prefetch = 0 : i64, scratch_operands = 0 : i64, tpu.core_type = #tpu.core_type<tc>, window_params = [{transform_indices = @transform_0, window_bounds = array<i64: 20, 256>}, {transform_indices = @transform_1, window_bounds = array<i64: 1, 256>}, {transform_indices = @transform_2, window_bounds = array<i64: 1, 256>}, {transform_indices = @transform_3, window_bounds = array<i64: 20, 256>}]} {
    %c0 = arith.constant 0 : index
    %c0_0 = arith.constant 0 : index
    %0 = vector.load %arg1[%c0, %c0_0] : memref<20x256xf32, #tpu.memory_space<vmem>>, vector<20x256xf32>
    %cst = arith.constant dense<0.000000e+00> : vector<256xf32>
    %1 = vector.multi_reduction <add>, %0, %cst [0] : vector<20x256xf32> to vector<256xf32>
    %2 = vector.shape_cast %1 : vector<256xf32> to vector<1x256xf32>
    %cst_1 = arith.constant 2.000000e+01 : f32
    %3 = vector.broadcast %cst_1 : f32 to vector<1x256xf32>
    %4 = arith.divf %2, %3 : vector<1x256xf32>
    %5 = vector.broadcast %4 : vector<1x256xf32> to vector<20x256xf32>
    %6 = arith.subf %0, %5 : vector<20x256xf32>
    %7 = arith.mulf %6, %6 : vector<20x256xf32>
    %cst_2 = arith.constant dense<0.000000e+00> : vector<256xf32>
    %8 = vector.multi_reduction <add>, %7, %cst_2 [0] : vector<20x256xf32> to vector<256xf32>
    %9 = vector.shape_cast %8 : vector<256xf32> to vector<1x256xf32>
    %cst_3 = arith.constant 2.000000e+01 : f32
    %10 = vector.broadcast %cst_3 : f32 to vector<1x256xf32>
    %11 = arith.divf %9, %10 : vector<1x256xf32>
    %c0_4 = arith.constant 0 : index
    %c0_5 = arith.constant 0 : index
    %12 = vector.load %arg2[%c0_4, %c0_5] : memref<1x256xf32, #tpu.memory_space<vmem>>, vector<1x256xf32>
    %cst_6 = arith.constant 9.99999974E-6 : f32
    %13 = vector.broadcast %cst_6 : f32 to vector<1x256xf32>
    %14 = arith.addf %11, %13 : vector<1x256xf32>
    %15 = math.rsqrt %14 : vector<1x256xf32>
    %16 = arith.mulf %12, %15 : vector<1x256xf32>
    %17 = vector.broadcast %16 : vector<1x256xf32> to vector<20x256xf32>
    %18 = arith.mulf %6, %17 : vector<20x256xf32>
    %c0_7 = arith.constant 0 : index
    %c0_8 = arith.constant 0 : index
    %19 = vector.load %arg3[%c0_7, %c0_8] : memref<1x256xf32, #tpu.memory_space<vmem>>, vector<1x256xf32>
    %20 = vector.broadcast %19 : vector<1x256xf32> to vector<20x256xf32>
    %21 = arith.addf %18, %20 : vector<20x256xf32>
    %c0_9 = arith.constant 0 : index
    %c0_10 = arith.constant 0 : index
    %22 = vector.load %arg4[%c0_9, %c0_10] : memref<20x256xf32, #tpu.memory_space<vmem>>, vector<20x256xf32>
    tpu.vector_store %arg4[%c0_9, %c0_10], %21 {strides = array<i32>} : memref<20x256xf32, #tpu.memory_space<vmem>>, vector<20x256xf32>,
    return
  }
  func.func @transform_0(%arg0: i32) -> (i32, i32) {
    %c0_i32 = arith.constant 0 : i32
    %c0_i32_0 = arith.constant 0 : i32
    return %c0_i32, %arg0 : i32, i32
  }
  func.func @transform_1(%arg0: i32) -> (i32, i32) {
    %c0_i32 = arith.constant 0 : i32
    %c0_i32_0 = arith.constant 0 : i32
    return %c0_i32, %arg0 : i32, i32
  }
  func.func @transform_2(%arg0: i32) -> (i32, i32) {
    %c0_i32 = arith.constant 0 : i32
    %c0_i32_0 = arith.constant 0 : i32
    return %c0_i32, %arg0 : i32, i32
  }
  func.func @transform_3(%arg0: i32) -> (i32, i32) {
    %c0_i32 = arith.constant 0 : i32
    %c0_i32_0 = arith.constant 0 : i32
    return %c0_i32, %arg0 : i32, i32
  }
}

</mosaic_0001>

<bundles_post_ra>
// kernel: tpu_custom_call.1
= control target key start
LH: loop header
LB: loop body
LE: loop exit
PB: predicated region body
PF: predicated region fallthrough
CT: control target
= control target key end

     0   :  { %8 = vsyncpa [#allocation3], 0  ;;  %s397_s0 = inlined_call_operand.hbm [shape: f32[20,256], index: 0, kind: input, shape index: {}]   ;;  %s398_s1 = inlined_call_operand.hbm [shape: f32[1,256], index: 1, kind: input, shape index: {}]   ;;  %s399_s2 = inlined_call_operand.hbm [shape: f32[1,256], index: 2, kind: input, shape index: {}]   ;;  %s400_s3 = inlined_call_operand.hbm [shape: f32[20,256], index: 3, kind: output, shape index: {}]  }
   0x1   :  { %9 = vsyncpa [#allocation6], 0  ;;  %s29_s14 = sshll.u32 %s398_s1, 4  ;;  %s30_s14 = int_to_ptr.hbm [resolvable:$true] %s29_s14 }
   0x2   :  { %10 = vsyncpa [#allocation4], 0  ;;  %s318_s15 = smov [#allocation5]   ;;  %s15_s19 = sshll.u32 %s397_s0, 4  ;;  %s16_s19 = int_to_ptr.hbm [resolvable:$true] %s15_s19 }
   0x3   :  { %s31_s16 = sshll.u32 %s318_s15, 4  ;;  %s319_s20 = smov [#allocation2]   ;;  %s32_s16 = int_to_ptr.vmem [resolvable:$true] %s31_s16 }
   0x4   :  { %34 = dma.hbm_to_vmem [thread:$0]  %s30_s14, 32, %s32_s16, [#allocation6]  }
   0x5   :  { %s17_s21 = sshll.u32 %s319_s20, 4  ;;  %s320_s22 = smov 256   ;;  %s18_s21 = int_to_ptr.vmem [resolvable:$true] %s17_s21 }
   0x6   :  { %s321_s23 = smov 16   ;;  %s40_s25 = sshll.u32 %s399_s2, 4  ;;  %s41_s25 = int_to_ptr.hbm [resolvable:$true] %s40_s25 }
   0x7   :  { %23 = dma.hbm_to_vmem [thread:$0]  %s16_s19, 768, %s18_s21, [#allocation3], %s320_s22, %s320_s22, %s321_s23  }
   0x8   :  { %s322_s26 = smov [#allocation7]  }
   0x9   :  { %s42_s27 = sshll.u32 %s322_s26, 4  ;;  %s43_s27 = int_to_ptr.vmem [resolvable:$true] %s42_s27 }
   0xa   :  { %45 = dma.hbm_to_vmem [thread:$0]  %s41_s25, 32, %s43_s27, [#allocation6]  }
   0xb   :  { %312 = dma.done.wait [#allocation3], 768  }
   0xc   :  { %313 = vsyncadd [#allocation3], 4294966528 }
   0xd   :  { %314 = dma.done.wait [#allocation6], 64  }
   0xe   :  { %315 = vsyncadd [#allocation6], 4294967232  ;;  %v323_v0 = vmov 20.0   ;;  %vm65_vm0 = vcmask 1043456   ;;  %v58_v2 = vld [vmem:[#allocation2] sm:$0xff]  ;;  %v59_v3 = vld [vmem:[#allocation2 + $0x8] sm:$0xff] }
   0xf   :  { %210 = vrcp.f32 %v323_v0  ;;  %v60_v4 = vld [vmem:[#allocation2 + $0x10] sm:$0xff]  ;;  %v61_v5 = vld [vmem:[#allocation2 + $0x18] sm:$0xff]  ;;  %v62_v6 = vld [vmem:[#allocation2 + $0x20] sm:$0xf]  ;;  %vm150_vm8 = vcmask 1040384   ;;  %s324_s0 = smov [#allocation8]  }
  0x10   :  { %v63_v7 = vld [vmem:[#allocation2 + $0x28] sm:$0xf]  ;;  %v64_v8 = vadd.f32 %v60_v4, %v58_v2  ;;  %v66_v10 = vsel %vm65_vm0, %v62_v6, 0.0  ;;  %v74_v11 = vadd.f32 %v61_v5, %v59_v3  ;;  %s187_s2 = sshll.u32 %s324_s0, 4  ;;  %s189_s30 = sshll.u32 %s400_s3, 4  ;;  %s188_s2 = int_to_ptr.vmem [resolvable:$true] %s187_s2  ;;  %s190_s30 = int_to_ptr.hbm [resolvable:$true] %s189_s30 }
  0x11   :  { %v75_v12 = vsel %vm65_vm0, %v63_v7, 0.0 }
  0x12   :  { %v67_v13 = vadd.f32 %v66_v10, %v64_v8  ;;  %v76_v15 = vadd.f32 %v75_v12, %v74_v11 }
  0x14   :  { %v68_v16 = vrot.slane %v67_v13, 4  ;;  %v77_v17 = vrot.slane %v76_v15, 4 }
  0x15   :  { %v211_v1 = vpop.eup %210 }
  0x16   :  { %v84_v9 = vmul.f32 20.0, %v211_v1  ;;  %v69_v18 = vadd.f32 %v68_v16, %v67_v13  ;;  %v78_v20 = vadd.f32 %v77_v17, %v76_v15  ;;  %vm88_vm1 = vweird.f32 %v211_v1  ;;  %v124_v17 = vld [vmem:[#allocation5] sm:$0x3] }
  0x18   :  { %v85_v14 = vsub.f32 1.0, %v84_v9  ;;  %v70_v21 = vrot.slane %v69_v18, 2  ;;  %v79_v22 = vrot.slane %v78_v20, 2 }
  0x1a   :  { %v86_v19 = vmul.f32 %v211_v1, %v85_v14  ;;  %v71_v23 = vadd.f32 %v70_v21, %v69_v18  ;;  %v80_v25 = vadd.f32 %v79_v22, %v78_v20  ;;  %v165_v20 = vld [vmem:[#allocation7] sm:$0x3] }
  0x1c   :  { %v87_v24 = vadd.f32 %v211_v1, %v86_v19  ;;  %v72_v26 = vrot.slane %v71_v23, 1  ;;  %v81_v27 = vrot.slane %v80_v25, 1 }
  0x1e   :  { %v73_v28 = vadd.f32 %v72_v26, %v71_v23  ;;  %v89_v29 = vsel %vm88_vm1, %v211_v1, %v87_v24  ;;  %v82_v30 = vadd.f32 %v81_v27, %v80_v25  ;;  %v167_v23 = vperm.slane %v165_v20, 0 }
  0x1f   :  { %v168_v25 = vperm.slane %v165_v20, 1 }
  0x20   :  { %v90_v31 = vmul.f32 %v89_v29, %v73_v28  ;;  %v91_v32 = vmul.f32 %v89_v29, %v82_v30 }
  0x22   :  { %v359_v33 = vsub.f32 %v58_v2, %v90_v31  ;;  %v361_v34 = vsub.f32 %v60_v4, %v90_v31  ;;  %v363_v35 = vsub.f32 %v62_v6, %v90_v31  ;;  %v365_v36 = vsub.f32 %v59_v3, %v91_v32 }
  0x23   :  { %v367_v37 = vsub.f32 %v61_v5, %v91_v32  ;;  %v369_v38 = vsub.f32 %v63_v7, %v91_v32 }
  0x24   :  { %v98_v39 = vmul.f32 %v359_v33, %v359_v33  ;;  %v100_v40 = vmul.f32 %v361_v34, %v361_v34  ;;  %v102_v41 = vmul.f32 %v363_v35, %v363_v35  ;;  %v99_v42 = vmul.f32 %v365_v36, %v365_v36 }
  0x25   :  { %v101_v43 = vmul.f32 %v367_v37, %v367_v37  ;;  %v103_v44 = vmul.f32 %v369_v38, %v369_v38 }
  0x26   :  { %v104_v45 = vadd.f32 %v100_v40, %v98_v39  ;;  %v105_v46 = vsel %vm65_vm0, %v102_v41, 0.0 }
  0x27   :  { %v113_v47 = vadd.f32 %v101_v43, %v99_v42  ;;  %v114_v48 = vsel %vm65_vm0, %v103_v44, 0.0 }
  0x28   :  { %v106_v49 = vadd.f32 %v105_v46, %v104_v45 }
  0x29   :  { %v115_v50 = vadd.f32 %v114_v48, %v113_v47 }
  0x2a   :  { %v107_v51 = vrot.slane %v106_v49, 4 }
  0x2b   :  { %v116_v52 = vrot.slane %v115_v50, 4 }
  0x2c   :  { %v108_v53 = vadd.f32 %v107_v51, %v106_v49 }
  0x2d   :  { %v117_v54 = vadd.f32 %v116_v52, %v115_v50 }
  0x2e   :  { %v109_v55 = vrot.slane %v108_v53, 2 }
  0x2f   :  { %v118_v56 = vrot.slane %v117_v54, 2 }
  0x30   :  { %v110_v57 = vadd.f32 %v109_v55, %v108_v53 }
  0x31   :  { %v119_v58 = vadd.f32 %v118_v56, %v117_v54 }
  0x32   :  { %v111_v59 = vrot.slane %v110_v57, 1 }
  0x33   :  { %v120_v60 = vrot.slane %v119_v58, 1 }
  0x34   :  { %v112_v61 = vadd.f32 %v111_v59, %v110_v57 }
  0x35   :  { %v121_v62 = vadd.f32 %v120_v60, %v119_v58 }
  0x36   :  { %v122_v63 = vmul.f32 %v112_v61, %v89_v29 }
  0x37   :  { %v123_v0 = vmul.f32 %v121_v62, %v89_v29 }
  0x38   :  { %v125_v1 = vadd.f32 1e-05, %v122_v63 }
  0x39   :  { %v126_v2 = vadd.f32 1e-05, %v123_v0 }
  0x3a   :  { %212 = vrsqrt.f32 %v125_v1  ;;  %vm133_vm2 = vweird.f32 %v125_v1 }
  0x3b   :  { %214 = vrsqrt.f32 %v126_v2  ;;  %vm143_vm4 = vweird.f32 %v126_v2 }
  0x40   :  { %v213_v3 = vpop.eup %212 }
  0x41   :  { %v215_v4 = vpop.eup %214  ;;  %v128_v5 = vmul.f32 %v213_v3, %v125_v1  ;;  %vm134_vm3 = vweird.f32 %v213_v3 }
  0x42   :  { %v138_v6 = vmul.f32 %v215_v4, %v126_v2  ;;  %vm144_vm5 = vweird.f32 %v215_v4  ;;  %vm135_vm6 = vmor %vm133_vm2, %vm134_vm3 }
  0x43   :  { %v129_v7 = vmul.f32 %v213_v3, %v128_v5  ;;  %vm145_vm7 = vmor %vm143_vm4, %vm144_vm5 }
  0x44   :  { %v139_v8 = vmul.f32 %v215_v4, %v138_v6 }
  0x45   :  { %v130_v9 = vmul.f32 0.5, %v129_v7 }
  0x46   :  { %v140_v10 = vmul.f32 0.5, %v139_v8 }
  0x47   :  { %v131_v11 = vsub.f32 1.5, %v130_v9 }
  0x48   :  { %v141_v12 = vsub.f32 1.5, %v140_v10 }
  0x49   :  { %v132_v13 = vmul.f32 %v213_v3, %v131_v11 }
  0x4a   :  { %v142_v14 = vmul.f32 %v215_v4, %v141_v12 }
  0x4b   :  { %v136_v15 = vsel %vm135_vm6, %v213_v3, %v132_v13 }
  0x4c   :  { %v146_v16 = vsel %vm145_vm7, %v215_v4, %v142_v14 }
  0x4d   :  { %v149_v18 = vrot.slane %v146_v16, 7 }
  0x4f   :  { %v151_v19 = vsel %vm150_vm8, %v136_v15, %v149_v18 }
  0x50   :  { %v153_v21 = vmul.f32 %v151_v19, %v124_v17 }
  0x52   :  { %v155_v22 = vperm.slane %v153_v21, 0  ;;  %v156_v24 = vperm.slane %v153_v21, 1 }
  0x54   :  { %v159_v26 = vmul.f32 %v155_v22, %v359_v33  ;;  %v160_v27 = vmul.f32 %v156_v24, %v365_v36  ;;  %v161_v28 = vmul.f32 %v155_v22, %v361_v34  ;;  %v162_v29 = vmul.f32 %v156_v24, %v367_v37 }
  0x55   :  { %v163_v30 = vmul.f32 %v155_v22, %v363_v35  ;;  %v164_v31 = vmul.f32 %v156_v24, %v369_v38 }
  0x56   :  { %v171_v32 = vadd.f32 %v167_v23, %v159_v26  ;;  %v172_v39 = vadd.f32 %v168_v25, %v160_v27  ;;  %v173_v40 = vadd.f32 %v167_v23, %v161_v28  ;;  %v174_v41 = vadd.f32 %v168_v25, %v162_v29 }
  0x57   :  { %v175_v42 = vadd.f32 %v167_v23, %v163_v30  ;;  %v176_v33 = vadd.f32 %v168_v25, %v164_v31 }
  0x58   :  { %177 = vst [vmem:[#allocation8] sm:$0xff] %v171_v32 }
  0x59   :  { %178 = vst [vmem:[#allocation8 + $0x8] sm:$0xff] %v172_v39 }
  0x5a   :  { %179 = vst [vmem:[#allocation8 + $0x10] sm:$0xff] %v173_v40 }
  0x5b   :  { %180 = vst [vmem:[#allocation8 + $0x18] sm:$0xff] %v174_v41 }
  0x5c   :  { %181 = vst [vmem:[#allocation8 + $0x20] sm:$0xf] %v175_v42 }
  0x5d   :  { %182 = vst [vmem:[#allocation8 + $0x28] sm:$0xf] %v176_v33 }
  0x5e   :  { %195 = dma.vmem_to_hbm [thread:$0]  %s188_s2, 768, %s190_s30, [#allocation4], %s320_s22, %s320_s22, %s321_s23  }
  0x5f   :  { %316 = dma.done.wait [#allocation4], 768  }
  0x60   :  { %317 = vsyncadd [#allocation4], 4294966528 }
  0x61   :  { %200 = vsyncpa [#allocation3], 1 }
  0x62   :  { %201 = vsyncpa [#allocation6], 1 }
  0x63   :  { %202 = vsyncpa [#allocation4], 1 }

</bundles_post_ra>
